<compile_context>
chip_gen: v5e
topology: v5e:2x2
jax: 0.10.0
libtpu: 0.0.40
codegen_flags: <defaults>
</compile_context>

<pallas_src>
import jax
import jax.numpy as jnp
from jax.experimental import pallas as pl
from jax.experimental.pallas import tpu as pltpu


# ---------------------------------------------------------------------------
# Kernels
# ---------------------------------------------------------------------------
def _scale_kernel(x_ref, gamma_ref, o_ref):
    # x_ref: (TM, D) tile, gamma_ref: (1, D) -> broadcasts over rows.
    o_ref[...] = x_ref[...] * gamma_ref[...]


def _scale_mask_kernel(x_ref, gamma_ref, mask_ref, o_ref):
    # mask block: (TM, 1) per-row or (TM, D) per-element; it arrives in its
    # narrow on-the-wire dtype and is converted here (HBM traffic stays narrow).
    o_ref[...] = x_ref[...] * gamma_ref[...] * mask_ref[...].astype(x_ref.dtype)


def _make_folded_rowmask_kernel(d, fold):
    """Per-row mask with rows folded into the 128-lane axis.

    x/o blocks are (TM, 128) holding `fold` logical rows of width `d` per
    sublane row; the mask block is (TM, fold) (one value per logical row) and
    is expanded across its `d` lanes in-kernel with cheap VPU selects.  Mask
    HBM traffic stays at 1 element per logical row and output stores are
    lane-dense (full-width vst).
    """
    def kernel(x_ref, gamma_ref, mask_ref, o_ref):
        x = x_ref[...]
        m = mask_ref[...].astype(x.dtype)                           # (TM, fold)
        lane_grp = jax.lax.broadcasted_iota(jnp.int32, (1, 128), 1) // d
        mexp = jnp.broadcast_to(m[:, 0:1], x.shape)
        for j in range(1, fold):
            mexp = jnp.where(lane_grp == j, m[:, j:j + 1], mexp)
        o_ref[...] = x * gamma_ref[...] * mexp
    return kernel


# ---------------------------------------------------------------------------
# Sizing helpers
# ---------------------------------------------------------------------------
def _round_up(v, m):
    return ((v + m - 1) // m) * m


def _lane_pad(w):
    return _round_up(max(int(w), 1), 128)


def _vmem_capacity_bytes():
    fn = getattr(pltpu, "get_tpu_info", None)
    if fn is not None:
        try:
            cap = getattr(fn(), "vmem_capacity_bytes", None)
            if cap:
                return int(cap)
        except Exception:
            pass
    return 64 << 20  # conservative default: v7x per-TensorCore VMEM


def _derive_budgets(user_budget):
    cap = _vmem_capacity_bytes()
    if user_budget is None:
        # ~half of physical VMEM: 32 MiB on v7x, 64 MiB on v5e/v6e.
        budget = max(16 << 20, min(64 << 20, cap // 2))
    else:
        budget = min(int(user_budget), max(16 << 20, cap - (8 << 20)))
    # Per-block byte target for the x stream (bigger blocks amortize the
    # ~0.35 us per-grid-step overhead; v7x's 3.2 TB/s needs >= ~4 MiB).
    block_target = max(2 << 20, min(16 << 20, budget // 4))
    return budget, block_target, cap


def _pick_tm(rows, streams, *, budget_bytes, fixed_bytes, block_target_bytes, sub):
    """Largest row tile whose double-buffered streams fit the budget.

    streams: list of (lane_padded_width_elems, itemsize) per row-tiled stream
    (x first, then out, then mask).  fixed_bytes covers the (1, D) gamma block.
    """
    if rows <= sub:
        return rows
    per_row = max(1, sum(2 * w * isz for (w, isz) in streams))   # x2 double buf
    tm_budget = max(sub, max(budget_bytes - fixed_bytes, 0) // per_row)
    xw, xisz = streams[0]
    tm_target = max(sub, block_target_bytes // max(xw * xisz, 1))
    tm = min(tm_budget, tm_target)
    # Guarantee >= 2 grid steps so both v7x TensorCores get DMA work.
    half = _round_up((rows + 1) // 2, sub)
    tm = min(tm, half)
    # Snap to the native sublane multiple (keeps stores full-width, no padding).
    tm = max(sub, (tm // sub) * sub)
    return tm


def _vmem_limit_bytes(tm, streams, fixed_bytes, vmem_cap):
    used = fixed_bytes + tm * sum(2 * w * isz for (w, isz) in streams)
    limit = int(used * 1.5) + (4 << 20)
    limit = max(limit, 16 << 20)
    limit = min(limit, max(16 << 20, vmem_cap - (4 << 20)))
    return int(limit)


# ---------------------------------------------------------------------------
# Wrapper
# ---------------------------------------------------------------------------
def layer_scale(x, gamma, mask=None, *, vmem_budget_bytes=None,
                min_pallas_bytes=256 << 10):
    """LayerScale forward: x * gamma [* mask].  x: (..., D), gamma: (D,)."""
    orig_shape = x.shape
    dtype = x.dtype
    D = int(orig_shape[-1])
    M = 1
    for s in orig_shape[:-1]:
        M *= int(s)

    # ----- tiny-input fallback: launch + HBM round trip would dominate ------
    if M * D * x.dtype.itemsize < min_pallas_bytes:
        y = x * gamma.astype(dtype)
        if mask is not None:
            y = y * jnp.asarray(mask).astype(dtype)
        return y

    budget, block_target, vmem_cap = _derive_budgets(vmem_budget_bytes)

    x2 = x.reshape(M, D)
    gamma2 = gamma.reshape(1, D).astype(dtype)   # cast once, outside the kernel
    xisz = x2.dtype.itemsize
    can_fold = (D < 128) and (128 % D == 0) and ((M * D) % 128 == 0)

    def _launch(kernel, rows, lanes, x_arr, g_arr, m_arr=None, m_lanes=None):
        # Streams (lane-padded width, itemsize): x, out, optional mask.
        streams = [(_lane_pad(lanes), xisz), (_lane_pad(lanes), xisz)]
        min_isz = xisz
        if m_arr is not None:
            streams.append((_lane_pad(m_lanes), m_arr.dtype.itemsize))
            min_isz = min(min_isz, m_arr.dtype.itemsize)
        sub = max(8, 32 // max(1, min_isz))           # 8 f32 / 16 bf16 / 32 int8
        fixed = 2 * 8 * _lane_pad(lanes) * xisz       # double-buffered (1,D) gamma
        tm = _pick_tm(rows, streams, budget_bytes=budget, fixed_bytes=fixed,
                      block_target_bytes=block_target, sub=sub)
        limit = _vmem_limit_bytes(tm, streams, fixed, vmem_cap)

        in_specs = [pl.BlockSpec((tm, lanes), lambda i: (i, 0)),
                    pl.BlockSpec((1, lanes), lambda i: (0, 0))]
        args = [x_arr, g_arr]
        if m_arr is not None:
            in_specs.append(pl.BlockSpec((tm, m_lanes), lambda i: (i, 0)))
            args.append(m_arr)

        return pl.pallas_call(
            kernel,
            out_shape=jax.ShapeDtypeStruct((rows, lanes), dtype),
            grid=(pl.cdiv(rows, tm),),
            in_specs=in_specs,
            out_specs=pl.BlockSpec((tm, lanes), lambda i: (i, 0)),
            compiler_params=pltpu.CompilerParams(
                dimension_semantics=("parallel",),    # lets v7x use both TCs
                vmem_limit_bytes=limit,               # derived, generation-aware
            ),
        )(*args)

    # ----- no-mask path ------------------------------------------------------
    if mask is None:
        Ml, Dl, xf, gf = M, D, x2, gamma2
        if can_fold:
            fold = 128 // D
            Ml, Dl = (M * D) // 128, 128
            xf = x2.reshape(Ml, Dl)
            gf = jnp.tile(gamma2, (1, fold))
        out = _launch(_scale_kernel, Ml, Dl, xf, gf)
        return out.reshape(orig_shape)

    # ----- masked paths ------------------------------------------------------
    mask = jnp.asarray(mask)
    if mask.dtype == jnp.bool_:
        mask = mask.astype(jnp.int8)   # keep HBM traffic narrow; cast in-kernel

    per_row = (mask.ndim == 0) or (mask.shape[-1] == 1)

    if per_row:
        # One scalar per row: ship (M, 1) (or folded (Ml, fold)); never
        # materialize the (M, D) mask in HBM.
        mask2 = jnp.broadcast_to(mask, orig_shape[:-1] + (1,)).reshape(M, 1)
        fold = (128 // D) if can_fold else 1
        if can_fold and fold <= 32:
            Ml = M // fold
            xf = x2.reshape(Ml, 128)
            gf = jnp.tile(gamma2, (1, fold))
            mf = mask2.reshape(Ml, fold)
            out = _launch(_make_folded_rowmask_kernel(D, fold), Ml, 128,
                          xf, gf, m_arr=mf, m_lanes=fold)
        else:
            out = _launch(_scale_mask_kernel, M, D, x2, gamma2,
                          m_arr=mask2, m_lanes=1)
        return out.reshape(orig_shape)

    # Mask genuinely varies along D: it must be read full-width anyway.
    mask2 = jnp.broadcast_to(mask, orig_shape).reshape(M, D)
    if can_fold:
        fold = 128 // D
        Ml = (M * D) // 128
        xf = x2.reshape(Ml, 128)
        gf = jnp.tile(gamma2, (1, fold))
        mf = mask2.reshape(Ml, 128)
        out = _launch(_scale_mask_kernel, Ml, 128, xf, gf, m_arr=mf, m_lanes=128)
    else:
        out = _launch(_scale_mask_kernel, M, D, x2, gamma2, m_arr=mask2, m_lanes=D)
    return out.reshape(orig_shape)


# ---------------------------------------------------------------------------
# Self-test
# ---------------------------------------------------------------------------
if __name__ == "__main__":
    key = jax.random.PRNGKey(0)

    # Small shapes matching the module: batch=2, seq=8, projection_dim=32.
    B, S, D = 2, 8, 32
    init_values = 1e-5
    gamma = jnp.full((D,), init_values, dtype=jnp.float32)  # torch.full((D,), init)

    kx, km = jax.random.split(key)
    x = jax.random.normal(kx, (B, S, D), dtype=jnp.float32)
    mask = (jax.random.uniform(km, (B, S, 1)) > 0.5).astype(jnp.float32)

    y = jax.block_until_ready(layer_scale(x, gamma))
    assert jnp.allclose(y, x * gamma, atol=1e-6), "no-mask mismatch"
    ym = jax.block_until_ready(layer_scale(x, gamma, mask))
    assert jnp.allclose(ym, x * gamma * mask, atol=1e-6), "mask mismatch"

    # ---- larger shapes that exercise each pipelined Pallas path ------------
    # 1) no-mask, lane-dense fold (D=32 folded to 128 lanes)
    xs = jax.random.normal(jax.random.PRNGKey(1), (4, 2048, 32), dtype=jnp.float32)
    gs = jnp.full((32,), 0.5, dtype=jnp.float32)
    ys = jax.block_until_ready(layer_scale(xs, gs))
    assert jnp.allclose(ys, xs * gs, atol=1e-6), "folded no-mask mismatch"

    # 2) per-row bool mask, folded path (mask shipped as int8, expanded in-kernel)
    ms = jax.random.uniform(jax.random.PRNGKey(2), (4, 2048, 1)) > 0.5
    ysm = jax.block_until_ready(layer_scale(xs, gs, ms))
    assert jnp.allclose(ysm, xs * gs * ms.astype(jnp.float32), atol=1e-6), \
        "folded row-mask mismatch"

    # 3) per-row float mask, wide-D path (D=256, no fold)
    xw = jax.random.normal(jax.random.PRNGKey(3), (2, 4096, 256), dtype=jnp.float32)
    gw = jnp.full((256,), 0.5, dtype=jnp.float32)
    mw = (jax.random.uniform(jax.random.PRNGKey(4), (2, 4096, 1)) > 0.5).astype(jnp.float32)
    yw = jax.block_until_ready(layer_scale(xw, gw, mw))
    assert jnp.allclose(yw, xw * gw * mw, atol=1e-6), "row-mask mismatch"

    # 4) full per-element bool mask, shipped narrow (int8) and cast in-kernel
    mf = jax.random.uniform(jax.random.PRNGKey(5), (2, 4096, 256)) > 0.5
    yf = jax.block_until_ready(layer_scale(xw, gw, mf))
    assert jnp.allclose(yf, xw * gw * mf.astype(jnp.float32), atol=1e-6), \
        "full-mask mismatch"

    print("KERNEL_OK")
</pallas_src>

<mosaic_0001>
module attributes {stable_mosaic.version = 11 : i64} {
  func.func @_scale_kernel(%arg0: i32, %arg1: memref<1024x128xf32, #tpu.memory_space<vmem>>, %arg2: memref<1x128xf32, #tpu.memory_space<vmem>>, %arg3: memref<1024x128xf32, #tpu.memory_space<vmem>>) attributes {dimension_semantics = [#tpu.dimension_semantics<parallel>], iteration_bounds = array<i64: 2>, scalar_prefetch = 0 : i64, scratch_operands = 0 : i64, tpu.core_type = #tpu.core_type<tc>, window_params = [{transform_indices = @transform_0, window_bounds = array<i64: 1024, 128>}, {pipeline_mode = #tpu.pipeline_mode<synchronous>, transform_indices = @transform_1, window_bounds = array<i64: 1, 128>}, {transform_indices = @transform_2, window_bounds = array<i64: 1024, 128>}]} {
    %c0 = arith.constant 0 : index
    %c0_0 = arith.constant 0 : index
    %0 = vector.load %arg1[%c0, %c0_0] : memref<1024x128xf32, #tpu.memory_space<vmem>>, vector<1024x128xf32>
    %c0_1 = arith.constant 0 : index
    %c0_2 = arith.constant 0 : index
    %1 = vector.load %arg2[%c0_1, %c0_2] : memref<1x128xf32, #tpu.memory_space<vmem>>, vector<1x128xf32>
    %2 = vector.broadcast %1 : vector<1x128xf32> to vector<1024x128xf32>
    %3 = arith.mulf %0, %2 : vector<1024x128xf32>
    %c0_3 = arith.constant 0 : index
    %c0_4 = arith.constant 0 : index
    %4 = vector.load %arg3[%c0_3, %c0_4] : memref<1024x128xf32, #tpu.memory_space<vmem>>, vector<1024x128xf32>
    tpu.vector_store %arg3[%c0_3, %c0_4], %3 {strides = array<i32>} : memref<1024x128xf32, #tpu.memory_space<vmem>>, vector<1024x128xf32>,
    return
  }
  func.func @transform_0(%arg0: i32) -> (i32, i32) {
    %c0_i32 = arith.constant 0 : i32
    %c0_i32_0 = arith.constant 0 : i32
    return %arg0, %c0_i32 : i32, i32
  }
  func.func @transform_1(%arg0: i32) -> (i32, i32) {
    %c0_i32 = arith.constant 0 : i32
    %c0_i32_0 = arith.constant 0 : i32
    %c0_i32_1 = arith.constant 0 : i32
    return %c0_i32, %c0_i32_0 : i32, i32
  }
  func.func @transform_2(%arg0: i32) -> (i32, i32) {
    %c0_i32 = arith.constant 0 : i32
    %c0_i32_0 = arith.constant 0 : i32
    return %arg0, %c0_i32 : i32, i32
  }
}

</mosaic_0001>

<bundles_post_ra>
// kernel: tpu_custom_call.1
= control target key start
LH: loop header
LB: loop body
LE: loop exit
PB: predicated region body
PF: predicated region fallthrough
CT: control target
= control target key end

     0   :  { %7 = vsyncpa [#allocation3], 0  ;;  %s1433_s0 = inlined_call_operand.hbm [shape: f32[2048,128], index: 0, kind: input, shape index: {}]   ;;  %s1434_s1 = inlined_call_operand.hbm [shape: f32[1,128], index: 1, kind: input, shape index: {}]   ;;  %s1435_s2 = inlined_call_operand.hbm [shape: f32[2048,128], index: 2, kind: output, shape index: {}]  }
   0x1   :  { %9 = vsyncpa [#allocation3 + $0x1], 0 }
   0x2   :  { %10 = vsyncpa [#allocation6], 0 }
   0x3   :  { %11 = vsyncpa [#allocation4], 0 }
   0x4   :  { %13 = vsyncpa [#allocation4 + $0x1], 0  ;;  %s900_s9 = smov 0   ;;  %s902_s10 = smov 0  }
   0x5   :  { %s904_s11 = smov 0   ;;  %s906_s12 = smov 0  }
   0x6 LB: > { %s921_s13 = sadd.s32 4294967295, %s878_s12   ;;  %s668_s14 = sadd.s32 4294967294, %s878_s12   ;;  %s878_s12 = sphi %s906_s12, %s1446_s12   ;;  %s874_s11 = sphi %s904_s11, %s1445_s11   ;;  %s870_s10 = sphi %s902_s10, %s1444_s10   ;;  %s866_s9 = sphi %s900_s9, %s1443_s9  }
   0x7   : > { %s925_s15 = sadd.s32 1, %s878_s12   ;;  %s26_s16 = sadd.s32 1, %s874_s11 }
   0x8   : > { %s23_s17 = ssub.s32 %s878_s12, %s925_s15  ;;  %p33_p0 = scmp.ne.s32.totalorder %s874_s11, %s870_s10 }
   0x9   : > { %p24_p1 = scmp.eq.s32.totalorder %s23_s17, 0  ;;  %p34_p2 = scmp.eq.s32.totalorder %s878_s12, 0 }
   0xa   : > { %p39_p3 = scmp.ne.s32.totalorder %s870_s10, %s866_s9  ;;  %p40_p4 = scmp.eq.s32.totalorder %s921_s13, 0 }
   0xb   : > { %s937_s18 = scalar_select %p24_p1, %s874_s11, %s26_s16  }
   0xc   : > { %p939_p5 = por %p34_p2, %p33_p0  ;;  %p945_p6 = por %p40_p4, %p39_p3 }
   0xd   : > { %p84_p7 = scmp.eq.s32.totalorder %s921_s13, 1  ;;  %p90_p8 = scmp.eq.s32.totalorder %s668_s14, 1 }
   0xe   : > { %p669_p9 = scmp.ge.s32.totalorder %s878_s12, 1  ;;  %p97_p10 = scmp.lt.s32.totalorder %s878_s12, 3 }
   0xf   : > { %p952_p11 = por %p84_p7, %p33_p0  ;;  %p956_p12 = por %p90_p8, %p39_p3 }
  0x10   : > { %p960_p13 = pnand %p669_p9, %p97_p10  ;;  %s109_s26 = sshll.u32 %s1434_s1, 4  ;;  %s110_s26 = int_to_ptr.hbm [resolvable:$true] %s109_s26 }
  0x11   : > { %s880_s27 = smov [#allocation5]   ;;  %p707_p3 = scmp.lt.s32.totalorder %s878_s12, 2 }
  0x12   : > { %p694_p1 = pneg %p960_p13  ;;  %s111_s28 = sshll.u32 %s880_s27, 4  ;;  %s112_s28 = int_to_ptr.vmem [resolvable:$true] %s111_s28 }
  0x13   : > { %s122_s29 = sand.u32 1, %s874_s11   ;;  %p976_p7 = pnand %p707_p3, %p939_p5 }
  0x14   : > { %p695_p2 = pnand %p694_p1, %p40_p4  ;;  %s672_s3 = sshll.u32 %s122_s29, 10 }
  0x15   : > { %s684_s4 = sshll.u32 %s878_s12, 10  ;;  %s126_s14 = scalar_lea.vmem [#allocation2], %s672_s3 }
  0x16   : > { %697 = dma.hbm_to_vmem [thread:$0]  (!%p695_p2), %s110_s26, 16, %s112_s28, [#allocation6]  }
  0x17   : > { %s131_s7 = scalar_lea.hbm %s1433_s0, %s684_s4  ;;  %s134_s16 = sshll.u32 %s126_s14, 4  ;;  %s135_s16 = int_to_ptr.vmem [resolvable:$true] %s134_s16 }
  0x18   : > { %s132_s8 = sshll.u32 %s131_s7, 4  ;;  %s123_s17 = scalar_lea.sflag [#allocation3], %s122_s29  ;;  %s133_s8 = int_to_ptr.hbm [resolvable:$true] %s132_s8 }
  0x19   : > { %s778_s24 = sshra.s32 %s133_s8, 4  ;;  %p782_p8 = pneg %p976_p7  ;;  %s779_s24 = int_to_ptr.hbm [resolvable:$true] %s778_s24 }
  0x1a   : > { %s780_s19 = scalar_lea.hbm %s779_s24, 1024  ;;  %s785_s27 = scalar_lea.hbm %s1433_s0, 2048 }
  0x1b   : > { %p781_p5 = scmp.ne.s32.totalorder %s779_s24, %s780_s19  ;;  %p786_p1 = scmp.lt.s32.totalorder %s779_s24, %s1433_s0 }
  0x1c   : > { %p787_p2 = scmp.lt.s32.totalorder %s785_s27, %s780_s19 }
  0x1d   : > { %p783_p9 = pnand %p782_p8, %p781_p5 }
  0x1e   : > { %p788_p3 = por %p787_p2, %p786_p1 }
  0x1f   : > { %p784_p10 = pneg %p783_p9 }
  0x21   : > { %p789_p0 = pnand %p788_p3, %p784_p10 }
  0x23   : > { %792 = shalt.err (!%p789_p0)
}
  0x24   : > { %s881_s29 = smov 128   ;;  %s882_s3 = smov 8  }
  0x25   : > { %701 = dma.hbm_to_vmem [thread:$0]  (!%p976_p7), %s133_s8, 16384, %s135_s16, %s123_s17, %s881_s29, %s881_s29, %s882_s3  }
  0x26   : > { %146 = sbr.rel (%p960_p13) target bundleno = 181 (0xb5), region = 28  ;;  %s997_s5 = sand.u32 (!%p960_p13), 1, %s870_s10  }
  0x27   : > { %s676_s6 = sshll.u32 (!%p960_p13), %s997_s5, 10  ;;  %s149_s7 = scalar_lea.sflag (!%p960_p13), [#allocation3], %s997_s5 }
  0x28   : > { %s1001_s14 = scalar_lea.vmem (!%p960_p13), [#allocation2], %s676_s6 }
  0x2b   : > { %853 = dma.done.wait (%p945_p6), %s149_s7, 16384  }
  0x2c   : > { %855 = vsyncadd (%p945_p6), %s149_s7, 4294950912 }
  0x2d   : > { %857 = dma.done.wait (%p40_p4), [#allocation6], 16  }
  0x2e   : > { %859 = vsyncadd (%p40_p4), [#allocation6], 4294967280  ;;  %v181_v0 = vld [vmem:[%s1001_s14] sm:$0xff]  ;;  %v182_v2 = vld [vmem:[%s1001_s14 + $0x8] sm:$0xff]  ;;  %s1024_s20 = scalar_lea.vmem [#allocation7], %s676_s6  ;;  %s685_s23 = sshll.u32 %s921_s13, 10 }
  0x2f   : > { %v1012_v1 = vld [vmem:[#allocation5] ss:$0 sm:$0xff]  ;;  %v183_v3 = vld [vmem:[%s1001_s14 + $0x10] sm:$0xff]  ;;  %v184_v4 = vld [vmem:[%s1001_s14 + $0x18] sm:$0xff]  ;;  %s581_s13 = scalar_lea.hbm %s1435_s2, %s685_s23  ;;  %s582_s16 = sshll.u32 %s1024_s20, 4  ;;  %s583_s16 = int_to_ptr.vmem [resolvable:$true] %s582_s16 }
  0x30   : > { %v313_v5 = vmul.f32 %v1012_v1, %v181_v0  ;;  %v314_v6 = vmul.f32 %v1012_v1, %v182_v2  ;;  %v315_v7 = vmul.f32 %v1012_v1, %v183_v3  ;;  %v185_v8 = vld [vmem:[%s1001_s14 + $0x20] sm:$0xff]  ;;  %v186_v9 = vld [vmem:[%s1001_s14 + $0x28] sm:$0xff]  ;;  %v316_v10 = vmul.f32 %v1012_v1, %v184_v4  ;;  %v187_v11 = vld [vmem:[%s1001_s14 + $0x30] sm:$0xff]  ;;  %s584_s17 = sshll.u32 %s581_s13, 4  ;;  %s570_s24 = scalar_lea.sflag [#allocation4], %s997_s5  ;;  %s585_s17 = int_to_ptr.hbm [resolvable:$true] %s584_s17 }
  0x31   : > { %v317_v12 = vmul.f32 %v1012_v1, %v185_v8  ;;  %v188_v13 = vld [vmem:[%s1001_s14 + $0x38] sm:$0xff]  ;;  %v318_v14 = vmul.f32 %v1012_v1, %v186_v9  ;;  %v189_v15 = vld [vmem:[%s1001_s14 + $0x40] sm:$0xff]  ;;  %v319_v16 = vmul.f32 %v1012_v1, %v187_v11  ;;  %v190_v17 = vld [vmem:[%s1001_s14 + $0x48] sm:$0xff]  ;;  %s822_s19 = sshra.s32 %s585_s17, 4  ;;  %s828_s28 = scalar_lea.hbm %s1435_s2, 2048  ;;  %s823_s19 = int_to_ptr.hbm [resolvable:$true] %s822_s19 }
  0x32   : > { %441 = vst [vmem:[%s1024_s20] sm:$0xff] %v313_v5  ;;  %v320_v18 = vmul.f32 %v1012_v1, %v188_v13  ;;  %v191_v19 = vld [vmem:[%s1001_s14 + $0x50] sm:$0xff]  ;;  %v321_v20 = vmul.f32 %v1012_v1, %v189_v15  ;;  %v192_v21 = vld [vmem:[%s1001_s14 + $0x58] sm:$0xff]  ;;  %v322_v22 = vmul.f32 %v1012_v1, %v190_v17  ;;  %v193_v23 = vld [vmem:[%s1001_s14 + $0x60] sm:$0xff]  ;;  %s824_s25 = scalar_lea.hbm %s823_s19, 1024  ;;  %p829_p0 = scmp.lt.s32.totalorder %s823_s19, %s1435_s2 }
  0x33   : > { %442 = vst [vmem:[%s1024_s20 + $0x8] sm:$0xff] %v314_v6  ;;  %v323_v24 = vmul.f32 %v1012_v1, %v191_v19  ;;  %v194_v25 = vld [vmem:[%s1001_s14 + $0x68] sm:$0xff]  ;;  %v324_v26 = vmul.f32 %v1012_v1, %v192_v21  ;;  %v195_v27 = vld [vmem:[%s1001_s14 + $0x70] sm:$0xff]  ;;  %v325_v28 = vmul.f32 %v1012_v1, %v193_v23  ;;  %v196_v29 = vld [vmem:[%s1001_s14 + $0x78] sm:$0xff]  ;;  %p825_p4 = scmp.ne.s32.totalorder %s823_s19, %s824_s25  ;;  %p830_p7 = scmp.lt.s32.totalorder %s828_s28, %s824_s25 }
  0x34   : > { %443 = vst [vmem:[%s1024_s20 + $0x10] sm:$0xff] %v315_v7  ;;  %v326_v30 = vmul.f32 %v1012_v1, %v194_v25  ;;  %v197_v31 = vld [vmem:[%s1001_s14 + $0x80] sm:$0xff]  ;;  %v327_v32 = vmul.f32 %v1012_v1, %v195_v27  ;;  %v198_v33 = vld [vmem:[%s1001_s14 + $0x88] sm:$0xff]  ;;  %v328_v34 = vmul.f32 %v1012_v1, %v196_v29  ;;  %v199_v35 = vld [vmem:[%s1001_s14 + $0x90] sm:$0xff] }
  0x35   : > { %444 = vst [vmem:[%s1024_s20 + $0x18] sm:$0xff] %v316_v10  ;;  %v329_v36 = vmul.f32 %v1012_v1, %v197_v31  ;;  %v200_v37 = vld [vmem:[%s1001_s14 + $0x98] sm:$0xff]  ;;  %v330_v38 = vmul.f32 %v1012_v1, %v198_v33  ;;  %v201_v39 = vld [vmem:[%s1001_s14 + $0xa0] sm:$0xff]  ;;  %v331_v40 = vmul.f32 %v1012_v1, %v199_v35  ;;  %v202_v41 = vld [vmem:[%s1001_s14 + $0xa8] sm:$0xff]  ;;  %p826_p6 = pnand %p825_p4, %p952_p11  ;;  %p831_p5 = por %p830_p7, %p829_p0 }
  0x36   : > { %445 = vst [vmem:[%s1024_s20 + $0x20] sm:$0xff] %v317_v12  ;;  %v332_v42 = vmul.f32 %v1012_v1, %v200_v37  ;;  %v203_v43 = vld [vmem:[%s1001_s14 + $0xb0] sm:$0xff]  ;;  %v333_v44 = vmul.f32 %v1012_v1, %v201_v39  ;;  %v204_v45 = vld [vmem:[%s1001_s14 + $0xb8] sm:$0xff]  ;;  %v334_v46 = vmul.f32 %v1012_v1, %v202_v41  ;;  %v205_v47 = vld [vmem:[%s1001_s14 + $0xc0] sm:$0xff] }
  0x37   : > { %446 = vst [vmem:[%s1024_s20 + $0x28] sm:$0xff] %v318_v14  ;;  %v335_v48 = vmul.f32 %v1012_v1, %v203_v43  ;;  %v206_v49 = vld [vmem:[%s1001_s14 + $0xc8] sm:$0xff]  ;;  %v336_v50 = vmul.f32 %v1012_v1, %v204_v45  ;;  %v207_v51 = vld [vmem:[%s1001_s14 + $0xd0] sm:$0xff]  ;;  %v337_v52 = vmul.f32 %v1012_v1, %v205_v47  ;;  %v208_v53 = vld [vmem:[%s1001_s14 + $0xd8] sm:$0xff]  ;;  %p827_p13 = pneg %p826_p6 }
  0x38   : > { %447 = vst [vmem:[%s1024_s20 + $0x30] sm:$0xff] %v319_v16  ;;  %v338_v54 = vmul.f32 %v1012_v1, %v206_v49  ;;  %v209_v55 = vld [vmem:[%s1001_s14 + $0xe0] sm:$0xff]  ;;  %v339_v56 = vmul.f32 %v1012_v1, %v207_v51  ;;  %v210_v57 = vld [vmem:[%s1001_s14 + $0xe8] sm:$0xff]  ;;  %v340_v58 = vmul.f32 %v1012_v1, %v208_v53  ;;  %v211_v59 = vld [vmem:[%s1001_s14 + $0xf0] sm:$0xff] }
  0x39   : > { %448 = vst [vmem:[%s1024_s20 + $0x38] sm:$0xff] %v320_v18  ;;  %v341_v60 = vmul.f32 %v1012_v1, %v209_v55  ;;  %v212_v61 = vld [vmem:[%s1001_s14 + $0xf8] sm:$0xff]  ;;  %v342_v62 = vmul.f32 %v1012_v1, %v210_v57  ;;  %v213_v63 = vld [vmem:[%s1001_s14 + $0x100] sm:$0xff]  ;;  %v343_v0 = vmul.f32 %v1012_v1, %v211_v59  ;;  %v214_v2 = vld [vmem:[%s1001_s14 + $0x108] sm:$0xff]  ;;  %p832_p8 = pnand %p831_p5, %p827_p13 }
  0x3a   : > { %449 = vst [vmem:[%s1024_s20 + $0x40] sm:$0xff] %v321_v20  ;;  %v344_v3 = vmul.f32 %v1012_v1, %v212_v61  ;;  %v215_v4 = vld [vmem:[%s1001_s14 + $0x110] sm:$0xff]  ;;  %v345_v5 = vmul.f32 %v1012_v1, %v213_v63  ;;  %v216_v6 = vld [vmem:[%s1001_s14 + $0x118] sm:$0xff]  ;;  %v346_v7 = vmul.f32 %v1012_v1, %v214_v2  ;;  %v217_v8 = vld [vmem:[%s1001_s14 + $0x120] sm:$0xff] }
  0x3b   : > { %450 = vst [vmem:[%s1024_s20 + $0x48] sm:$0xff] %v322_v22  ;;  %v347_v9 = vmul.f32 %v1012_v1, %v215_v4  ;;  %v218_v10 = vld [vmem:[%s1001_s14 + $0x128] sm:$0xff]  ;;  %v348_v11 = vmul.f32 %v1012_v1, %v216_v6  ;;  %v219_v12 = vld [vmem:[%s1001_s14 + $0x130] sm:$0xff]  ;;  %v349_v13 = vmul.f32 %v1012_v1, %v217_v8  ;;  %v220_v14 = vld [vmem:[%s1001_s14 + $0x138] sm:$0xff] }
  0x3c   : > { %451 = vst [vmem:[%s1024_s20 + $0x50] sm:$0xff] %v323_v24  ;;  %v350_v15 = vmul.f32 %v1012_v1, %v218_v10  ;;  %v221_v16 = vld [vmem:[%s1001_s14 + $0x140] sm:$0xff]  ;;  %v351_v17 = vmul.f32 %v1012_v1, %v219_v12  ;;  %v222_v18 = vld [vmem:[%s1001_s14 + $0x148] sm:$0xff]  ;;  %v352_v19 = vmul.f32 %v1012_v1, %v220_v14  ;;  %v223_v20 = vld [vmem:[%s1001_s14 + $0x150] sm:$0xff] }
  0x3d   : > { %452 = vst [vmem:[%s1024_s20 + $0x58] sm:$0xff] %v324_v26  ;;  %v353_v21 = vmul.f32 %v1012_v1, %v221_v16  ;;  %v224_v22 = vld [vmem:[%s1001_s14 + $0x158] sm:$0xff]  ;;  %v354_v23 = vmul.f32 %v1012_v1, %v222_v18  ;;  %v225_v24 = vld [vmem:[%s1001_s14 + $0x160] sm:$0xff]  ;;  %v355_v25 = vmul.f32 %v1012_v1, %v223_v20  ;;  %v226_v26 = vld [vmem:[%s1001_s14 + $0x168] sm:$0xff] }
  0x3e   : > { %453 = vst [vmem:[%s1024_s20 + $0x60] sm:$0xff] %v325_v28  ;;  %v356_v27 = vmul.f32 %v1012_v1, %v224_v22  ;;  %v227_v28 = vld [vmem:[%s1001_s14 + $0x170] sm:$0xff]  ;;  %v357_v29 = vmul.f32 %v1012_v1, %v225_v24  ;;  %v358_v31 = vmul.f32 %v1012_v1, %v226_v26 }
  0x3f   : > { %454 = vst [vmem:[%s1024_s20 + $0x68] sm:$0xff] %v326_v30  ;;  %v228_v30 = vld [vmem:[%s1001_s14 + $0x178] sm:$0xff]  ;;  %v359_v33 = vmul.f32 %v1012_v1, %v227_v28 }
  0x40   : > { %455 = vst [vmem:[%s1024_s20 + $0x70] sm:$0xff] %v327_v32  ;;  %v229_v32 = vld [vmem:[%s1001_s14 + $0x180] sm:$0xff]  ;;  %v360_v35 = vmul.f32 %v1012_v1, %v228_v30 }
  0x41   : > { %456 = vst [vmem:[%s1024_s20 + $0x78] sm:$0xff] %v328_v34  ;;  %v230_v34 = vld [vmem:[%s1001_s14 + $0x188] sm:$0xff]  ;;  %v361_v37 = vmul.f32 %v1012_v1, %v229_v32 }
  0x42   : > { %457 = vst [vmem:[%s1024_s20 + $0x80] sm:$0xff] %v329_v36  ;;  %v231_v36 = vld [vmem:[%s1001_s14 + $0x190] sm:$0xff]  ;;  %v362_v39 = vmul.f32 %v1012_v1, %v230_v34 }
  0x43   : > { %458 = vst [vmem:[%s1024_s20 + $0x88] sm:$0xff] %v330_v38  ;;  %v232_v38 = vld [vmem:[%s1001_s14 + $0x198] sm:$0xff]  ;;  %v363_v41 = vmul.f32 %v1012_v1, %v231_v36 }
  0x44   : > { %459 = vst [vmem:[%s1024_s20 + $0x90] sm:$0xff] %v331_v40  ;;  %v233_v40 = vld [vmem:[%s1001_s14 + $0x1a0] sm:$0xff]  ;;  %v364_v43 = vmul.f32 %v1012_v1, %v232_v38 }
  0x45   : > { %460 = vst [vmem:[%s1024_s20 + $0x98] sm:$0xff] %v332_v42  ;;  %v234_v42 = vld [vmem:[%s1001_s14 + $0x1a8] sm:$0xff]  ;;  %v365_v45 = vmul.f32 %v1012_v1, %v233_v40 }
  0x46   : > { %461 = vst [vmem:[%s1024_s20 + $0xa0] sm:$0xff] %v333_v44  ;;  %v235_v44 = vld [vmem:[%s1001_s14 + $0x1b0] sm:$0xff]  ;;  %v366_v47 = vmul.f32 %v1012_v1, %v234_v42 }
  0x47   : > { %462 = vst [vmem:[%s1024_s20 + $0xa8] sm:$0xff] %v334_v46  ;;  %v236_v46 = vld [vmem:[%s1001_s14 + $0x1b8] sm:$0xff]  ;;  %v367_v49 = vmul.f32 %v1012_v1, %v235_v44 }
  0x48   : > { %463 = vst [vmem:[%s1024_s20 + $0xb0] sm:$0xff] %v335_v48  ;;  %v237_v48 = vld [vmem:[%s1001_s14 + $0x1c0] sm:$0xff]  ;;  %v368_v51 = vmul.f32 %v1012_v1, %v236_v46 }
  0x49   : > { %464 = vst [vmem:[%s1024_s20 + $0xb8] sm:$0xff] %v336_v50  ;;  %v238_v50 = vld [vmem:[%s1001_s14 + $0x1c8] sm:$0xff]  ;;  %v369_v53 = vmul.f32 %v1012_v1, %v237_v48 }
  0x4a   : > { %465 = vst [vmem:[%s1024_s20 + $0xc0] sm:$0xff] %v337_v52  ;;  %v239_v52 = vld [vmem:[%s1001_s14 + $0x1d0] sm:$0xff]  ;;  %v370_v55 = vmul.f32 %v1012_v1, %v238_v50 }
  0x4b   : > { %466 = vst [vmem:[%s1024_s20 + $0xc8] sm:$0xff] %v338_v54  ;;  %v240_v54 = vld [vmem:[%s1001_s14 + $0x1d8] sm:$0xff]  ;;  %v371_v57 = vmul.f32 %v1012_v1, %v239_v52 }
  0x4c   : > { %467 = vst [vmem:[%s1024_s20 + $0xd0] sm:$0xff] %v339_v56  ;;  %v241_v56 = vld [vmem:[%s1001_s14 + $0x1e0] sm:$0xff]  ;;  %v372_v59 = vmul.f32 %v1012_v1, %v240_v54 }
  0x4d   : > { %468 = vst [vmem:[%s1024_s20 + $0xd8] sm:$0xff] %v340_v58  ;;  %v242_v58 = vld [vmem:[%s1001_s14 + $0x1e8] sm:$0xff]  ;;  %v373_v61 = vmul.f32 %v1012_v1, %v241_v56 }
  0x4e   : > { %469 = vst [vmem:[%s1024_s20 + $0xe0] sm:$0xff] %v341_v60  ;;  %v243_v60 = vld [vmem:[%s1001_s14 + $0x1f0] sm:$0xff]  ;;  %v374_v63 = vmul.f32 %v1012_v1, %v242_v58 }
  0x4f   : > { %470 = vst [vmem:[%s1024_s20 + $0xe8] sm:$0xff] %v342_v62  ;;  %v244_v62 = vld [vmem:[%s1001_s14 + $0x1f8] sm:$0xff]  ;;  %v375_v2 = vmul.f32 %v1012_v1, %v243_v60 }
  0x50   : > { %471 = vst [vmem:[%s1024_s20 + $0xf0] sm:$0xff] %v343_v0  ;;  %v245_v0 = vld [vmem:[%s1001_s14 + $0x200] sm:$0xff]  ;;  %v376_v4 = vmul.f32 %v1012_v1, %v244_v62 }
  0x51   : > { %472 = vst [vmem:[%s1024_s20 + $0xf8] sm:$0xff] %v344_v3  ;;  %v246_v3 = vld [vmem:[%s1001_s14 + $0x208] sm:$0xff]  ;;  %v377_v6 = vmul.f32 %v1012_v1, %v245_v0 }
  0x52   : > { %473 = vst [vmem:[%s1024_s20 + $0x100] sm:$0xff] %v345_v5  ;;  %v247_v5 = vld [vmem:[%s1001_s14 + $0x210] sm:$0xff]  ;;  %v378_v8 = vmul.f32 %v1012_v1, %v246_v3 }
  0x53   : > { %474 = vst [vmem:[%s1024_s20 + $0x108] sm:$0xff] %v346_v7  ;;  %v248_v7 = vld [vmem:[%s1001_s14 + $0x218] sm:$0xff]  ;;  %v379_v10 = vmul.f32 %v1012_v1, %v247_v5 }
  0x54   : > { %475 = vst [vmem:[%s1024_s20 + $0x110] sm:$0xff] %v347_v9  ;;  %v249_v9 = vld [vmem:[%s1001_s14 + $0x220] sm:$0xff]  ;;  %v380_v12 = vmul.f32 %v1012_v1, %v248_v7 }
  0x55   : > { %476 = vst [vmem:[%s1024_s20 + $0x118] sm:$0xff] %v348_v11  ;;  %v250_v11 = vld [vmem:[%s1001_s14 + $0x228] sm:$0xff]  ;;  %v381_v14 = vmul.f32 %v1012_v1, %v249_v9 }
  0x56   : > { %477 = vst [vmem:[%s1024_s20 + $0x120] sm:$0xff] %v349_v13  ;;  %v251_v13 = vld [vmem:[%s1001_s14 + $0x230] sm:$0xff]  ;;  %v382_v16 = vmul.f32 %v1012_v1, %v250_v11 }
  0x57   : > { %478 = vst [vmem:[%s1024_s20 + $0x128] sm:$0xff] %v350_v15  ;;  %v252_v15 = vld [vmem:[%s1001_s14 + $0x238] sm:$0xff]  ;;  %v383_v18 = vmul.f32 %v1012_v1, %v251_v13 }
  0x58   : > { %479 = vst [vmem:[%s1024_s20 + $0x130] sm:$0xff] %v351_v17  ;;  %v253_v17 = vld [vmem:[%s1001_s14 + $0x240] sm:$0xff]  ;;  %v384_v20 = vmul.f32 %v1012_v1, %v252_v15 }
  0x59   : > { %480 = vst [vmem:[%s1024_s20 + $0x138] sm:$0xff] %v352_v19  ;;  %v254_v19 = vld [vmem:[%s1001_s14 + $0x248] sm:$0xff]  ;;  %v385_v22 = vmul.f32 %v1012_v1, %v253_v17 }
  0x5a   : > { %481 = vst [vmem:[%s1024_s20 + $0x140] sm:$0xff] %v353_v21  ;;  %v255_v21 = vld [vmem:[%s1001_s14 + $0x250] sm:$0xff]  ;;  %v386_v24 = vmul.f32 %v1012_v1, %v254_v19 }
  0x5b   : > { %482 = vst [vmem:[%s1024_s20 + $0x148] sm:$0xff] %v354_v23  ;;  %v256_v23 = vld [vmem:[%s1001_s14 + $0x258] sm:$0xff]  ;;  %v387_v26 = vmul.f32 %v1012_v1, %v255_v21 }
  0x5c   : > { %483 = vst [vmem:[%s1024_s20 + $0x150] sm:$0xff] %v355_v25  ;;  %v257_v25 = vld [vmem:[%s1001_s14 + $0x260] sm:$0xff]  ;;  %v388_v28 = vmul.f32 %v1012_v1, %v256_v23 }
  0x5d   : > { %484 = vst [vmem:[%s1024_s20 + $0x158] sm:$0xff] %v356_v27  ;;  %v258_v27 = vld [vmem:[%s1001_s14 + $0x268] sm:$0xff]  ;;  %v389_v30 = vmul.f32 %v1012_v1, %v257_v25 }
  0x5e   : > { %485 = vst [vmem:[%s1024_s20 + $0x160] sm:$0xff] %v357_v29  ;;  %v259_v29 = vld [vmem:[%s1001_s14 + $0x270] sm:$0xff]  ;;  %v390_v32 = vmul.f32 %v1012_v1, %v258_v27 }
  0x5f   : > { %486 = vst [vmem:[%s1024_s20 + $0x168] sm:$0xff] %v358_v31  ;;  %v260_v31 = vld [vmem:[%s1001_s14 + $0x278] sm:$0xff]  ;;  %v391_v34 = vmul.f32 %v1012_v1, %v259_v29 }
  0x60   : > { %487 = vst [vmem:[%s1024_s20 + $0x170] sm:$0xff] %v359_v33  ;;  %v261_v33 = vld [vmem:[%s1001_s14 + $0x280] sm:$0xff]  ;;  %v392_v36 = vmul.f32 %v1012_v1, %v260_v31 }
  0x61   : > { %488 = vst [vmem:[%s1024_s20 + $0x178] sm:$0xff] %v360_v35  ;;  %v262_v35 = vld [vmem:[%s1001_s14 + $0x288] sm:$0xff]  ;;  %v393_v38 = vmul.f32 %v1012_v1, %v261_v33 }
  0x62   : > { %489 = vst [vmem:[%s1024_s20 + $0x180] sm:$0xff] %v361_v37  ;;  %v263_v37 = vld [vmem:[%s1001_s14 + $0x290] sm:$0xff]  ;;  %v394_v40 = vmul.f32 %v1012_v1, %v262_v35 }
  0x63   : > { %490 = vst [vmem:[%s1024_s20 + $0x188] sm:$0xff] %v362_v39  ;;  %v264_v39 = vld [vmem:[%s1001_s14 + $0x298] sm:$0xff]  ;;  %v395_v42 = vmul.f32 %v1012_v1, %v263_v37 }
  0x64   : > { %491 = vst [vmem:[%s1024_s20 + $0x190] sm:$0xff] %v363_v41  ;;  %v265_v41 = vld [vmem:[%s1001_s14 + $0x2a0] sm:$0xff]  ;;  %v396_v44 = vmul.f32 %v1012_v1, %v264_v39 }
  0x65   : > { %492 = vst [vmem:[%s1024_s20 + $0x198] sm:$0xff] %v364_v43  ;;  %v266_v43 = vld [vmem:[%s1001_s14 + $0x2a8] sm:$0xff]  ;;  %v397_v46 = vmul.f32 %v1012_v1, %v265_v41 }
  0x66   : > { %493 = vst [vmem:[%s1024_s20 + $0x1a0] sm:$0xff] %v365_v45  ;;  %v267_v45 = vld [vmem:[%s1001_s14 + $0x2b0] sm:$0xff]  ;;  %v398_v48 = vmul.f32 %v1012_v1, %v266_v43 }
  0x67   : > { %494 = vst [vmem:[%s1024_s20 + $0x1a8] sm:$0xff] %v366_v47  ;;  %v268_v47 = vld [vmem:[%s1001_s14 + $0x2b8] sm:$0xff]  ;;  %v399_v50 = vmul.f32 %v1012_v1, %v267_v45 }
  0x68   : > { %495 = vst [vmem:[%s1024_s20 + $0x1b0] sm:$0xff] %v367_v49  ;;  %v269_v49 = vld [vmem:[%s1001_s14 + $0x2c0] sm:$0xff]  ;;  %v400_v52 = vmul.f32 %v1012_v1, %v268_v47 }
  0x69   : > { %496 = vst [vmem:[%s1024_s20 + $0x1b8] sm:$0xff] %v368_v51  ;;  %v270_v51 = vld [vmem:[%s1001_s14 + $0x2c8] sm:$0xff]  ;;  %v401_v54 = vmul.f32 %v1012_v1, %v269_v49 }
  0x6a   : > { %497 = vst [vmem:[%s1024_s20 + $0x1c0] sm:$0xff] %v369_v53  ;;  %v271_v53 = vld [vmem:[%s1001_s14 + $0x2d0] sm:$0xff]  ;;  %v402_v56 = vmul.f32 %v1012_v1, %v270_v51 }
  0x6b   : > { %498 = vst [vmem:[%s1024_s20 + $0x1c8] sm:$0xff] %v370_v55  ;;  %v272_v55 = vld [vmem:[%s1001_s14 + $0x2d8] sm:$0xff]  ;;  %v403_v58 = vmul.f32 %v1012_v1, %v271_v53 }
  0x6c   : > { %499 = vst [vmem:[%s1024_s20 + $0x1d0] sm:$0xff] %v371_v57  ;;  %v273_v57 = vld [vmem:[%s1001_s14 + $0x2e0] sm:$0xff]  ;;  %v404_v60 = vmul.f32 %v1012_v1, %v272_v55 }
  0x6d   : > { %500 = vst [vmem:[%s1024_s20 + $0x1d8] sm:$0xff] %v372_v59  ;;  %v274_v59 = vld [vmem:[%s1001_s14 + $0x2e8] sm:$0xff]  ;;  %v405_v62 = vmul.f32 %v1012_v1, %v273_v57 }
  0x6e   : > { %501 = vst [vmem:[%s1024_s20 + $0x1e0] sm:$0xff] %v373_v61  ;;  %v275_v61 = vld [vmem:[%s1001_s14 + $0x2f0] sm:$0xff]  ;;  %v406_v0 = vmul.f32 %v1012_v1, %v274_v59 }
  0x6f   : > { %502 = vst [vmem:[%s1024_s20 + $0x1e8] sm:$0xff] %v374_v63  ;;  %v276_v63 = vld [vmem:[%s1001_s14 + $0x2f8] sm:$0xff]  ;;  %v407_v3 = vmul.f32 %v1012_v1, %v275_v61 }
  0x70   : > { %503 = vst [vmem:[%s1024_s20 + $0x1f0] sm:$0xff] %v375_v2  ;;  %v277_v2 = vld [vmem:[%s1001_s14 + $0x300] sm:$0xff]  ;;  %v408_v5 = vmul.f32 %v1012_v1, %v276_v63 }
  0x71   : > { %504 = vst [vmem:[%s1024_s20 + $0x1f8] sm:$0xff] %v376_v4  ;;  %v278_v4 = vld [vmem:[%s1001_s14 + $0x308] sm:$0xff]  ;;  %v409_v7 = vmul.f32 %v1012_v1, %v277_v2 }
  0x72   : > { %505 = vst [vmem:[%s1024_s20 + $0x200] sm:$0xff] %v377_v6  ;;  %v279_v6 = vld [vmem:[%s1001_s14 + $0x310] sm:$0xff]  ;;  %v410_v9 = vmul.f32 %v1012_v1, %v278_v4 }
  0x73   : > { %506 = vst [vmem:[%s1024_s20 + $0x208] sm:$0xff] %v378_v8  ;;  %v280_v8 = vld [vmem:[%s1001_s14 + $0x318] sm:$0xff]  ;;  %v411_v11 = vmul.f32 %v1012_v1, %v279_v6 }
  0x74   : > { %507 = vst [vmem:[%s1024_s20 + $0x210] sm:$0xff] %v379_v10  ;;  %v281_v10 = vld [vmem:[%s1001_s14 + $0x320] sm:$0xff]  ;;  %v412_v13 = vmul.f32 %v1012_v1, %v280_v8 }
  0x75   : > { %508 = vst [vmem:[%s1024_s20 + $0x218] sm:$0xff] %v380_v12  ;;  %v282_v12 = vld [vmem:[%s1001_s14 + $0x328] sm:$0xff]  ;;  %v413_v15 = vmul.f32 %v1012_v1, %v281_v10 }
  0x76   : > { %509 = vst [vmem:[%s1024_s20 + $0x220] sm:$0xff] %v381_v14  ;;  %v283_v14 = vld [vmem:[%s1001_s14 + $0x330] sm:$0xff]  ;;  %v414_v17 = vmul.f32 %v1012_v1, %v282_v12 }
  0x77   : > { %510 = vst [vmem:[%s1024_s20 + $0x228] sm:$0xff] %v382_v16  ;;  %v284_v16 = vld [vmem:[%s1001_s14 + $0x338] sm:$0xff]  ;;  %v415_v19 = vmul.f32 %v1012_v1, %v283_v14 }
  0x78   : > { %511 = vst [vmem:[%s1024_s20 + $0x230] sm:$0xff] %v383_v18  ;;  %v285_v18 = vld [vmem:[%s1001_s14 + $0x340] sm:$0xff]  ;;  %v416_v21 = vmul.f32 %v1012_v1, %v284_v16 }
  0x79   : > { %512 = vst [vmem:[%s1024_s20 + $0x238] sm:$0xff] %v384_v20  ;;  %v286_v20 = vld [vmem:[%s1001_s14 + $0x348] sm:$0xff]  ;;  %v417_v23 = vmul.f32 %v1012_v1, %v285_v18 }
  0x7a   : > { %513 = vst [vmem:[%s1024_s20 + $0x240] sm:$0xff] %v385_v22  ;;  %v287_v22 = vld [vmem:[%s1001_s14 + $0x350] sm:$0xff]  ;;  %v418_v25 = vmul.f32 %v1012_v1, %v286_v20 }
  0x7b   : > { %514 = vst [vmem:[%s1024_s20 + $0x248] sm:$0xff] %v386_v24  ;;  %v288_v24 = vld [vmem:[%s1001_s14 + $0x358] sm:$0xff]  ;;  %v419_v27 = vmul.f32 %v1012_v1, %v287_v22 }
  0x7c   : > { %515 = vst [vmem:[%s1024_s20 + $0x250] sm:$0xff] %v387_v26  ;;  %v289_v26 = vld [vmem:[%s1001_s14 + $0x360] sm:$0xff]  ;;  %v420_v29 = vmul.f32 %v1012_v1, %v288_v24 }
  0x7d   : > { %516 = vst [vmem:[%s1024_s20 + $0x258] sm:$0xff] %v388_v28  ;;  %v290_v28 = vld [vmem:[%s1001_s14 + $0x368] sm:$0xff]  ;;  %v421_v31 = vmul.f32 %v1012_v1, %v289_v26 }
  0x7e   : > { %517 = vst [vmem:[%s1024_s20 + $0x260] sm:$0xff] %v389_v30  ;;  %v291_v30 = vld [vmem:[%s1001_s14 + $0x370] sm:$0xff]  ;;  %v422_v33 = vmul.f32 %v1012_v1, %v290_v28 }
  0x7f   : > { %518 = vst [vmem:[%s1024_s20 + $0x268] sm:$0xff] %v390_v32  ;;  %v292_v32 = vld [vmem:[%s1001_s14 + $0x378] sm:$0xff]  ;;  %v423_v35 = vmul.f32 %v1012_v1, %v291_v30 }
  0x80   : > { %519 = vst [vmem:[%s1024_s20 + $0x270] sm:$0xff] %v391_v34  ;;  %v293_v34 = vld [vmem:[%s1001_s14 + $0x380] sm:$0xff]  ;;  %v424_v37 = vmul.f32 %v1012_v1, %v292_v32 }
  0x81   : > { %520 = vst [vmem:[%s1024_s20 + $0x278] sm:$0xff] %v392_v36  ;;  %v294_v36 = vld [vmem:[%s1001_s14 + $0x388] sm:$0xff]  ;;  %v425_v39 = vmul.f32 %v1012_v1, %v293_v34 }
  0x82   : > { %521 = vst [vmem:[%s1024_s20 + $0x280] sm:$0xff] %v393_v38  ;;  %v295_v38 = vld [vmem:[%s1001_s14 + $0x390] sm:$0xff]  ;;  %v426_v41 = vmul.f32 %v1012_v1, %v294_v36 }
  0x83   : > { %522 = vst [vmem:[%s1024_s20 + $0x288] sm:$0xff] %v394_v40  ;;  %v296_v40 = vld [vmem:[%s1001_s14 + $0x398] sm:$0xff]  ;;  %v427_v43 = vmul.f32 %v1012_v1, %v295_v38 }
  0x84   : > { %523 = vst [vmem:[%s1024_s20 + $0x290] sm:$0xff] %v395_v42  ;;  %v297_v42 = vld [vmem:[%s1001_s14 + $0x3a0] sm:$0xff]  ;;  %v428_v45 = vmul.f32 %v1012_v1, %v296_v40 }
  0x85   : > { %524 = vst [vmem:[%s1024_s20 + $0x298] sm:$0xff] %v396_v44  ;;  %v298_v44 = vld [vmem:[%s1001_s14 + $0x3a8] sm:$0xff]  ;;  %v429_v47 = vmul.f32 %v1012_v1, %v297_v42 }
  0x86   : > { %525 = vst [vmem:[%s1024_s20 + $0x2a0] sm:$0xff] %v397_v46  ;;  %v299_v46 = vld [vmem:[%s1001_s14 + $0x3b0] sm:$0xff]  ;;  %v430_v49 = vmul.f32 %v1012_v1, %v298_v44 }
  0x87   : > { %526 = vst [vmem:[%s1024_s20 + $0x2a8] sm:$0xff] %v398_v48  ;;  %v300_v48 = vld [vmem:[%s1001_s14 + $0x3b8] sm:$0xff]  ;;  %v431_v51 = vmul.f32 %v1012_v1, %v299_v46 }
  0x88   : > { %527 = vst [vmem:[%s1024_s20 + $0x2b0] sm:$0xff] %v399_v50  ;;  %v301_v50 = vld [vmem:[%s1001_s14 + $0x3c0] sm:$0xff]  ;;  %v432_v53 = vmul.f32 %v1012_v1, %v300_v48 }
  0x89   : > { %528 = vst [vmem:[%s1024_s20 + $0x2b8] sm:$0xff] %v400_v52  ;;  %v302_v52 = vld [vmem:[%s1001_s14 + $0x3c8] sm:$0xff]  ;;  %v433_v55 = vmul.f32 %v1012_v1, %v301_v50 }
  0x8a   : > { %529 = vst [vmem:[%s1024_s20 + $0x2c0] sm:$0xff] %v401_v54  ;;  %v303_v54 = vld [vmem:[%s1001_s14 + $0x3d0] sm:$0xff]  ;;  %v434_v57 = vmul.f32 %v1012_v1, %v302_v52 }
  0x8b   : > { %530 = vst [vmem:[%s1024_s20 + $0x2c8] sm:$0xff] %v402_v56  ;;  %v304_v56 = vld [vmem:[%s1001_s14 + $0x3d8] sm:$0xff]  ;;  %v435_v59 = vmul.f32 %v1012_v1, %v303_v54 }
  0x8c   : > { %531 = vst [vmem:[%s1024_s20 + $0x2d0] sm:$0xff] %v403_v58  ;;  %v305_v58 = vld [vmem:[%s1001_s14 + $0x3e0] sm:$0xff]  ;;  %v436_v61 = vmul.f32 %v1012_v1, %v304_v56 }
  0x8d   : > { %532 = vst [vmem:[%s1024_s20 + $0x2d8] sm:$0xff] %v404_v60  ;;  %v306_v60 = vld [vmem:[%s1001_s14 + $0x3e8] sm:$0xff]  ;;  %v437_v63 = vmul.f32 %v1012_v1, %v305_v58 }
  0x8e   : > { %533 = vst [vmem:[%s1024_s20 + $0x2e0] sm:$0xff] %v405_v62  ;;  %v307_v62 = vld [vmem:[%s1001_s14 + $0x3f0] sm:$0xff]  ;;  %v438_v2 = vmul.f32 %v1012_v1, %v306_v60 }
  0x8f   : > { %534 = vst [vmem:[%s1024_s20 + $0x2e8] sm:$0xff] %v406_v0  ;;  %v308_v0 = vld [vmem:[%s1001_s14 + $0x3f8] sm:$0xff] }
  0x90   : > { %535 = vst [vmem:[%s1024_s20 + $0x2f0] sm:$0xff] %v407_v3  ;;  %v439_v3 = vmul.f32 %v1012_v1, %v307_v62  ;;  %v440_v4 = vmul.f32 %v1012_v1, %v308_v0 }
  0x91   : > { %536 = vst [vmem:[%s1024_s20 + $0x2f8] sm:$0xff] %v408_v5 }
  0x92   : > { %537 = vst [vmem:[%s1024_s20 + $0x300] sm:$0xff] %v409_v7 }
  0x93   : > { %538 = vst [vmem:[%s1024_s20 + $0x308] sm:$0xff] %v410_v9 }
  0x94   : > { %539 = vst [vmem:[%s1024_s20 + $0x310] sm:$0xff] %v411_v11 }
  0x95   : > { %540 = vst [vmem:[%s1024_s20 + $0x318] sm:$0xff] %v412_v13 }
  0x96   : > { %541 = vst [vmem:[%s1024_s20 + $0x320] sm:$0xff] %v413_v15 }
  0x97   : > { %542 = vst [vmem:[%s1024_s20 + $0x328] sm:$0xff] %v414_v17 }
  0x98   : > { %543 = vst [vmem:[%s1024_s20 + $0x330] sm:$0xff] %v415_v19 }
  0x99   : > { %544 = vst [vmem:[%s1024_s20 + $0x338] sm:$0xff] %v416_v21 }
  0x9a   : > { %545 = vst [vmem:[%s1024_s20 + $0x340] sm:$0xff] %v417_v23 }
  0x9b   : > { %546 = vst [vmem:[%s1024_s20 + $0x348] sm:$0xff] %v418_v25 }
  0x9c   : > { %547 = vst [vmem:[%s1024_s20 + $0x350] sm:$0xff] %v419_v27 }
  0x9d   : > { %548 = vst [vmem:[%s1024_s20 + $0x358] sm:$0xff] %v420_v29 }
  0x9e   : > { %549 = vst [vmem:[%s1024_s20 + $0x360] sm:$0xff] %v421_v31 }
  0x9f   : > { %550 = vst [vmem:[%s1024_s20 + $0x368] sm:$0xff] %v422_v33 }
  0xa0   : > { %551 = vst [vmem:[%s1024_s20 + $0x370] sm:$0xff] %v423_v35 }
  0xa1   : > { %552 = vst [vmem:[%s1024_s20 + $0x378] sm:$0xff] %v424_v37 }
  0xa2   : > { %553 = vst [vmem:[%s1024_s20 + $0x380] sm:$0xff] %v425_v39 }
  0xa3   : > { %554 = vst [vmem:[%s1024_s20 + $0x388] sm:$0xff] %v426_v41 }
  0xa4   : > { %555 = vst [vmem:[%s1024_s20 + $0x390] sm:$0xff] %v427_v43 }
  0xa5   : > { %556 = vst [vmem:[%s1024_s20 + $0x398] sm:$0xff] %v428_v45 }
  0xa6   : > { %557 = vst [vmem:[%s1024_s20 + $0x3a0] sm:$0xff] %v429_v47 }
  0xa7   : > { %558 = vst [vmem:[%s1024_s20 + $0x3a8] sm:$0xff] %v430_v49 }
  0xa8   : > { %559 = vst [vmem:[%s1024_s20 + $0x3b0] sm:$0xff] %v431_v51 }
  0xa9   : > { %560 = vst [vmem:[%s1024_s20 + $0x3b8] sm:$0xff] %v432_v53 }
  0xaa   : > { %561 = vst [vmem:[%s1024_s20 + $0x3c0] sm:$0xff] %v433_v55 }
  0xab   : > { %562 = vst [vmem:[%s1024_s20 + $0x3c8] sm:$0xff] %v434_v57 }
  0xac   : > { %563 = vst [vmem:[%s1024_s20 + $0x3d0] sm:$0xff] %v435_v59 }
  0xad   : > { %564 = vst [vmem:[%s1024_s20 + $0x3d8] sm:$0xff] %v436_v61 }
  0xae   : > { %565 = vst [vmem:[%s1024_s20 + $0x3e0] sm:$0xff] %v437_v63 }
  0xaf   : > { %566 = vst [vmem:[%s1024_s20 + $0x3e8] sm:$0xff] %v438_v2 }
  0xb0   : > { %567 = vst [vmem:[%s1024_s20 + $0x3f0] sm:$0xff] %v439_v3 }
  0xb1   : > { %568 = vst [vmem:[%s1024_s20 + $0x3f8] sm:$0xff] %v440_v4 }
  0xb2   : > { %835 = shalt.err (!%p832_p8)
}
  0xb3   : > { %s883_s3 = smov 128   ;;  %s884_s5 = smov 8  }
  0xb4   : > { %692 = dma.vmem_to_hbm [thread:$0]  (%p952_p11), %s583_s16, 16384, %s585_s17, %s570_s24, %s883_s3, %s883_s3, %s884_s5  }
  0xb5 PF: > { %s599_s6 = sand.u32 1, %s866_s9   ;;  %p1442_p9 = scmp.ge.s32.totalorder %s878_s12, 2 }
  0xb6   : > { %s600_s7 = scalar_lea.sflag [#allocation4], %s599_s6 }
  0xb7   : > { %p703_p10 = pnand %p1442_p9, %p956_p12 }
  0xb9   : > { %p704_p1 = pneg %p703_p10 }
  0xbb   : > { %861 = dma.done.wait (%p704_p1), %s600_s7, 16384  }
  0xbc   : > { %863 = vsyncadd (%p704_p1), %s600_s7, 4294950912  ;;  %p16_p2 = scmp.ge.s32.totalorder %s925_s15, 4   ;;  %s1443_s9 = smov %s870_s10 }
  0xbd   : > { %s1444_s10 = smov %s874_s11  ;;  %s1445_s11 = smov %s937_s18 }
  0xbe   : > { %s1446_s12 = smov %s925_s15  ;;  %18 = sbr.rel (!%p16_p2) target bundleno = 6 (0x6), region = 77 }
  0xc3   :  { %606 = vsyncpa [#allocation3], 1 }
  0xc4   :  { %608 = vsyncpa [#allocation3 + $0x1], 1 }
  0xc5   :  { %609 = vsyncpa [#allocation6], 1 }
  0xc6   :  { %610 = vsyncpa [#allocation4], 1 }
  0xc7   :  { %612 = vsyncpa [#allocation4 + $0x1], 1 }

</bundles_post_ra>
